<compile_context>
chip_gen: v7x
topology: tpu7x:2x2x1
jax: 0.10.0
libtpu: 0.0.40
codegen_flags: <defaults>
</compile_context>

<pallas_src>
import jax
import jax.numpy as jnp
from jax.experimental import pallas as pl
from jax.experimental.pallas import tpu as pltpu


def _cnn_encoder_kernel(x_ref, w_ref, b_ref, o_ref):
    # x_ref: (TN, Lp, D)   bf16, zero-padded sequences for TN reviews
    # w_ref: (KW*D, Kpad)  bf16, taps concatenated along the contraction axis
    # b_ref: (1, Kpad)     f32 bias
    # o_ref: (TN, L, Kpad) bf16 (or f32) output
    TN, L, Kp = o_ref.shape
    Lp = x_ref.shape[1]
    D = x_ref.shape[2]
    KW = Lp - L + 1                                   # kernel width (Lp = L + 2*(KW//2))

    x = x_ref[...]                                    # (TN, Lp, D) bf16
    # im2col: for output position t, lanes [k*D:(k+1)*D) hold x_pad[t + k].
    xi = jnp.concatenate([x[:, k:k + L, :] for k in range(KW)], axis=-1)  # (TN, L, KW*D)
    xi = xi.reshape(TN * L, KW * D)                   # (TN*L, KW*D)

    # Single fused matmul on the MXU, f32 accumulation; bias + ReLU in f32; cast on store.
    acc = jnp.dot(xi, w_ref[...], preferred_element_type=jnp.float32)    # (TN*L, Kpad)
    acc = acc + b_ref[...]                            # broadcast (1, Kpad)
    o_ref[...] = jnp.maximum(acc, 0.0).reshape(TN, L, Kp).astype(o_ref.dtype)


def cnn_encoder_forward(review, word_emb, conv_weight, conv_bias,
                        review_length, word_dim, *,
                        block_n=None,
                        out_dtype=jnp.bfloat16,
                        trim_channels=True):
    """Pallas implementation of CnnEncoder.forward.

    review:      (B, R, L) int32 token ids
    word_emb:    (vocab, word_dim) embedding table
    conv_weight: (kernel_num, word_dim, kernel_width)  -- PyTorch Conv1d layout
    conv_bias:   (kernel_num,)
    returns:     (B * R, L, kernel_num) in out_dtype (bf16 by default; pass jnp.float32
                 for strict dtype parity).  trim_channels=False keeps the lane-padded
                 Kpad channel dim (fastest: no post-kernel copy pass).
    """
    B, R, L = review.shape
    assert L == review_length
    K, D, KW = conv_weight.shape
    assert D == word_dim
    assert KW % 2 == 1, "kernel_width must be odd for PyTorch 'same' padding=kw//2"
    pad = KW // 2
    N = B * R
    Lp = L + 2 * pad

    # Lane-dense output channels (K -> multiple of 128).
    Kpad = pl.cdiv(K, 128) * 128

    # ---- reviews per grid step -------------------------------------------------------
    out_itemsize = jnp.dtype(out_dtype).itemsize
    out_bytes_per_review = L * Kpad * out_itemsize          # kernel output block bytes / review
    in_bytes_per_review = Lp * D * 2                        # bf16 input block bytes / review

    if block_n is None:
        # Large-block regime: ~4 MiB output block AND >= 2048 MXU rows per step.
        tn_target = max(pl.cdiv(4 * 1024 * 1024, out_bytes_per_review),
                        pl.cdiv(2048, L))
        # Conservative double-buffered VMEM budget (~12 MiB) -> safe on v5e (16 MiB scoped
        # default), v6e (32 MiB default / 128 MiB phys) and v7x (32 MiB default / 64 MiB).
        vmem_budget = 12 * 1024 * 1024
        tn_vmem = max(1, vmem_budget // (2 * (out_bytes_per_review + in_bytes_per_review)))
        # Keep >= 4 grid steps: megacore / v7x 2-TC sharding + pipelining, bounded PAD waste.
        min_steps = 4
        tn_cap_n = max(1, pl.cdiv(N, min_steps))
        block_n = max(1, min(tn_target, tn_vmem, tn_cap_n))
    TN = block_n
    Npad = pl.cdiv(N, TN) * TN

    # --- embedding gather with the conv zero-padding folded in ------------------------
    # Extend the table with one all-zero row and pad the token ids with its index, so a
    # single gather directly produces the (Npad, Lp, D) zero-padded activations in bf16.
    PAD_ID = word_emb.shape[0]
    emb_ext = jnp.concatenate(
        [word_emb.astype(jnp.bfloat16), jnp.zeros((1, D), jnp.bfloat16)], axis=0)
    ids = review.reshape(N, L)
    ids = jnp.pad(ids, ((0, Npad - N), (pad, pad)), constant_values=PAD_ID)   # (Npad, Lp)
    x = jnp.take(emb_ext, ids, axis=0)                                        # (Npad, Lp, D) bf16

    # --- weights: (K, D, KW) -> (KW*D, Kpad), taps concatenated along contraction -----
    # w[k*D + d, co] = conv_weight[co, d, k]  (matches the im2col lane order in-kernel).
    w = jnp.transpose(conv_weight, (2, 1, 0)).reshape(KW * D, K).astype(jnp.bfloat16)
    w = jnp.pad(w, ((0, 0), (0, Kpad - K)))
    b = jnp.pad(conv_bias.astype(jnp.float32), (0, Kpad - K)).reshape(1, Kpad)

    out = pl.pallas_call(
        _cnn_encoder_kernel,
        out_shape=jax.ShapeDtypeStruct((Npad, L, Kpad), out_dtype),
        grid_spec=pltpu.PrefetchScalarGridSpec(
            num_scalar_prefetch=0,
            grid=(Npad // TN,),
            in_specs=[
                pl.BlockSpec((TN, Lp, D), lambda i: (i, 0, 0)),
                pl.BlockSpec((KW * D, Kpad), lambda i: (0, 0)),   # resident weight
                pl.BlockSpec((1, Kpad), lambda i: (0, 0)),        # resident bias
            ],
            out_specs=pl.BlockSpec((TN, L, Kpad), lambda i: (i, 0, 0)),
        ),
        compiler_params=pltpu.CompilerParams(
            dimension_semantics=("parallel",)),
    )(x, w, b)

    # Dropout: eval-mode -> identity (PyTorch Dropout is a no-op at inference).
    # Strip padding back to the module's output shape.  The :K lane slice forces an extra
    # XLA copy pass; for maximum throughput pass trim_channels=False and pad the consumer.
    if Npad != N:
        out = out[:N]
    if trim_channels and Kpad != K:
        out = out[:, :, :K]
    return out


def _reference(review, word_emb, conv_weight, conv_bias, quantize_bf16=True):
    """Pure-JAX f32 reference of the PyTorch forward for validation."""
    B, R, L = review.shape
    K, D, KW = conv_weight.shape
    pad = KW // 2
    we, cw = word_emb, conv_weight
    if quantize_bf16:  # mirror the kernel's bf16 input cast (f32 accumulation)
        we = we.astype(jnp.bfloat16).astype(jnp.float32)
        cw = cw.astype(jnp.bfloat16).astype(jnp.float32)
    emb = jnp.take(we, review.reshape(-1), axis=0).reshape(B * R, L, D)
    xp = jnp.pad(emb, ((0, 0), (pad, pad), (0, 0)))
    out = jnp.zeros((B * R, L, K), jnp.float32)
    for k in range(KW):
        out = out + jnp.einsum('nld,dk->nlk', xp[:, k:k + L, :], cw[:, :, k].T,
                               precision=jax.lax.Precision.HIGHEST)
    out = out + conv_bias[None, None, :]
    return jnp.maximum(out, 0.0)


if __name__ == "__main__":
    # Small, module-consistent shapes.
    batch_size = 2
    review_count = 3
    review_length = 8
    vocab_size = 50
    word_dim = 32        # config.word_dim
    kernel_num = 100     # config.kernel_num (padded to 128 inside the kernel)
    kernel_width = 3     # config.kernel_width

    key = jax.random.PRNGKey(0)
    k_tok, k_emb, k_w, k_b = jax.random.split(key, 4)

    review = jax.random.randint(
        k_tok, (batch_size, review_count, review_length), 0, vocab_size,
        dtype=jnp.int32)
    word_emb = jax.random.normal(k_emb, (vocab_size, word_dim), jnp.float32) * 0.1
    conv_weight = jax.random.normal(
        k_w, (kernel_num, word_dim, kernel_width), jnp.float32) * 0.1
    conv_bias = jax.random.normal(k_b, (kernel_num,), jnp.float32) * 0.1

    # Default fast path: bf16 output.
    out_bf16 = cnn_encoder_forward(review, word_emb, conv_weight, conv_bias,
                                   review_length, word_dim)
    out_bf16 = jax.block_until_ready(out_bf16)
    assert out_bf16.shape == (batch_size * review_count, review_length, kernel_num)
    assert out_bf16.dtype == jnp.bfloat16

    # Strict-dtype path: f32 output (same kernel, cast on store skipped).
    out_f32 = cnn_encoder_forward(review, word_emb, conv_weight, conv_bias,
                                  review_length, word_dim, out_dtype=jnp.float32)
    out_f32 = jax.block_until_ready(out_f32)
    assert out_f32.shape == (batch_size * review_count, review_length, kernel_num)

    # Tight check: f32-output kernel vs bf16-quantized-input reference (same numerics).
    ref_q = _reference(review, word_emb, conv_weight, conv_bias, quantize_bf16=True)
    err_q = jnp.max(jnp.abs(out_f32 - ref_q))
    assert jnp.allclose(out_f32, ref_q, atol=2e-3, rtol=2e-3), \
        f"max abs err (f32-out kernel vs bf16-input ref): {err_q}"

    # Loose checks: full-f32 module semantics (bf16 input cast / bf16 output rounding are
    # the only deviations).
    ref_f = _reference(review, word_emb, conv_weight, conv_bias, quantize_bf16=False)
    err_f32 = jnp.max(jnp.abs(out_f32 - ref_f))
    assert jnp.allclose(out_f32, ref_f, atol=1e-2, rtol=1e-2), \
        f"max abs err (f32-out kernel vs f32 ref): {err_f32}"
    err_bf16 = jnp.max(jnp.abs(out_bf16.astype(jnp.float32) - ref_f))
    assert jnp.allclose(out_bf16.astype(jnp.float32), ref_f, atol=2e-2, rtol=2e-2), \
        f"max abs err (bf16-out kernel vs f32 ref): {err_bf16}"

    print("KERNEL_OK")
</pallas_src>

<mosaic_0001>
module attributes {stable_mosaic.version = 11 : i64} {
  func.func @_cnn_encoder_kernel(%arg0: i32, %arg1: memref<2x10x32xbf16, #tpu.memory_space<vmem>>, %arg2: memref<96x128xbf16, #tpu.memory_space<vmem>>, %arg3: memref<1x128xf32, #tpu.memory_space<vmem>>, %arg4: memref<2x8x128xbf16, #tpu.memory_space<vmem>>) attributes {dimension_semantics = [#tpu.dimension_semantics<parallel>], iteration_bounds = array<i64: 3>, scalar_prefetch = 0 : i64, scratch_operands = 0 : i64, tpu.core_type = #tpu.core_type<tc>, window_params = [{transform_indices = @transform_0, window_bounds = array<i64: 2, 10, 32>}, {pipeline_mode = #tpu.pipeline_mode<synchronous>, transform_indices = @transform_1, window_bounds = array<i64: 96, 128>}, {pipeline_mode = #tpu.pipeline_mode<synchronous>, transform_indices = @transform_2, window_bounds = array<i64: 1, 128>}, {transform_indices = @transform_3, window_bounds = array<i64: 2, 8, 128>}]} {
    %c0 = arith.constant 0 : index
    %c0_0 = arith.constant 0 : index
    %c0_1 = arith.constant 0 : index
    %0 = vector.load %arg1[%c0, %c0_0, %c0_1] : memref<2x10x32xbf16, #tpu.memory_space<vmem>>, vector<2x10x32xbf16>
    %1 = vector.extract_strided_slice %0 {offsets = [0, 0, 0], sizes = [2, 8, 32], strides = [1, 1, 1]} : vector<2x10x32xbf16> to vector<2x8x32xbf16>
    %2 = vector.extract_strided_slice %0 {offsets = [0, 1, 0], sizes = [2, 8, 32], strides = [1, 1, 1]} : vector<2x10x32xbf16> to vector<2x8x32xbf16>
    %3 = vector.extract_strided_slice %0 {offsets = [0, 2, 0], sizes = [2, 8, 32], strides = [1, 1, 1]} : vector<2x10x32xbf16> to vector<2x8x32xbf16>
    %4 = tpu.concatenate %1, %2, %3 in 2 : vector<2x8x32xbf16>, vector<2x8x32xbf16>, vector<2x8x32xbf16> -> vector<2x8x96xbf16>
    %5 = vector.shape_cast %4 : vector<2x8x96xbf16> to vector<16x96xbf16>
    %c0_2 = arith.constant 0 : index
    %c0_3 = arith.constant 0 : index
    %6 = vector.load %arg2[%c0_2, %c0_3] : memref<96x128xbf16, #tpu.memory_space<vmem>>, vector<96x128xbf16>
    %cst = arith.constant dense<0.000000e+00> : vector<16x128xf32>
    %7 = tpu.matmul %5, %6, %cst {dimension_numbers = #tpu.dot_dimension_numbers<[1], [0], [0], [1], [0, 0, 1, 1], [], []>} : vector<16x96xbf16>, vector<96x128xbf16>, vector<16x128xf32> -> vector<16x128xf32>
    %c0_4 = arith.constant 0 : index
    %c0_5 = arith.constant 0 : index
    %8 = vector.load %arg3[%c0_4, %c0_5] : memref<1x128xf32, #tpu.memory_space<vmem>>, vector<1x128xf32>
    %9 = vector.broadcast %8 : vector<1x128xf32> to vector<16x128xf32>
    %10 = arith.addf %7, %9 : vector<16x128xf32>
    %cst_6 = arith.constant 0.000000e+00 : f32
    %11 = vector.broadcast %cst_6 : f32 to vector<16x128xf32>
    %12 = arith.maximumf %10, %11 : vector<16x128xf32>
    %13 = vector.shape_cast %12 : vector<16x128xf32> to vector<2x8x128xf32>
    %14 = arith.truncf %13 : vector<2x8x128xf32> to vector<2x8x128xbf16>
    %c0_7 = arith.constant 0 : index
    %c0_8 = arith.constant 0 : index
    %c0_9 = arith.constant 0 : index
    %15 = vector.load %arg4[%c0_7, %c0_8, %c0_9] : memref<2x8x128xbf16, #tpu.memory_space<vmem>>, vector<2x8x128xbf16>
    tpu.vector_store %arg4[%c0_7, %c0_8, %c0_9], %14 {strides = array<i32>} : memref<2x8x128xbf16, #tpu.memory_space<vmem>>, vector<2x8x128xbf16>,
    return
  }
  func.func @transform_0(%arg0: i32) -> (i32, i32, i32) {
    %c0_i32 = arith.constant 0 : i32
    %c0_i32_0 = arith.constant 0 : i32
    %c0_i32_1 = arith.constant 0 : i32
    return %arg0, %c0_i32, %c0_i32_0 : i32, i32, i32
  }
  func.func @transform_1(%arg0: i32) -> (i32, i32) {
    %c0_i32 = arith.constant 0 : i32
    %c0_i32_0 = arith.constant 0 : i32
    %c0_i32_1 = arith.constant 0 : i32
    return %c0_i32, %c0_i32_0 : i32, i32
  }
  func.func @transform_2(%arg0: i32) -> (i32, i32) {
    %c0_i32 = arith.constant 0 : i32
    %c0_i32_0 = arith.constant 0 : i32
    %c0_i32_1 = arith.constant 0 : i32
    return %c0_i32, %c0_i32_0 : i32, i32
  }
  func.func @transform_3(%arg0: i32) -> (i32, i32, i32) {
    %c0_i32 = arith.constant 0 : i32
    %c0_i32_0 = arith.constant 0 : i32
    %c0_i32_1 = arith.constant 0 : i32
    return %arg0, %c0_i32, %c0_i32_0 : i32, i32, i32
  }
}

</mosaic_0001>

<bundles_post_ra>
// kernel: tpu_custom_call.1
= control target key start
LH: loop header
LB: loop body
LE: loop exit
PB: predicated region body
PF: predicated region fallthrough
CT: control target
= control target key end

     0   :  { %8 = vsyncpa [#allocation3], 0  ;;  %s736_s0 = inlined_call_operand.vmem [shape: bf16[6,10,32], index: 0, kind: input, shape index: {}]   ;;  %s737_s1 = inlined_call_operand.vmem [shape: bf16[96,128], index: 1, kind: input, shape index: {}]   ;;  %s738_s2 = inlined_call_operand.vmem [shape: f32[1,128], index: 2, kind: input, shape index: {}]   ;;  %s739_s3 = inlined_call_operand.hbm [shape: bf16[6,8,128], index: 3, kind: output, shape index: {}]  }
   0x1   :  { %10 = vsyncpa [#allocation3 + $0x1], 0  ;;  %s609_s12 = smov 0   ;;  %s611_s13 = smov 0  }
   0x2   :  { %s613_s14 = smov 0   ;;  %s615_s15 = smov 0  }
   0x3 LB: > { %s630_s16 = sadd.s32 4294967295, %s581_s15   ;;  %s413_s17 = sadd.s32 4294967294, %s581_s15   ;;  %s581_s15 = sphi %s615_s15, %s745_s15   ;;  %s577_s14 = sphi %s613_s14, %s744_s14   ;;  %s573_s13 = sphi %s611_s13, %s743_s13   ;;  %s569_s12 = sphi %s609_s12, %s742_s12  }
   0x4   : > { %s634_s18 = sadd.s32 1, %s581_s15   ;;  %s91_s19 = sadd.s32 1, %s577_s14 }
   0x5   : > { %s88_s20 = ssub.s32 %s581_s15, %s634_s18  ;;  %p101_p0 = scmp.ne.s32.totalorder %s577_s14, %s573_s13 }
   0x6   : > { %p89_p1 = scmp.eq.s32.totalorder %s88_s20, 0  ;;  %p102_p2 = scmp.eq.s32.totalorder %s630_s16, 2 }
   0x7   : > { %p107_p3 = scmp.ne.s32.totalorder %s573_s13, %s569_s12  ;;  %p108_p4 = scmp.eq.s32.totalorder %s413_s17, 2 }
   0x8   : > { %s645_s21 = scalar_select %p89_p1, %s577_s14, %s91_s19  }
   0x9   : > { %p647_p5 = por %p102_p2, %p101_p0  ;;  %p651_p6 = por %p108_p4, %p107_p3 }
   0xa   : > { %p416_p7 = scmp.ge.s32.totalorder %s581_s15, 1  ;;  %p142_p8 = scmp.lt.s32.totalorder %s581_s15, 4 }
   0xc   : > { %p143_p9 = pnand %p416_p7, %p142_p8 }
   0xd   : > { %s418_s24 = sshll.u32 (!%p143_p9), %s630_s16, 1  ;;  %v513_v0 = vld [vmem:[%s737_s1] sm:$0xff] (!%p143_p9)   ;;  %v583_v1 = vmov (!%p143_p9), 0.0   ;;  %v514_v2 = vld [vmem:[%s737_s1 + $0x8] sm:$0xff] (!%p143_p9)   ;;  %v515_v3 = vld [vmem:[%s737_s1 + $0x10] sm:$0xff] (!%p143_p9)   ;;  %vm584_vm0 = vmmov (!%p143_p9), 0  }
   0xe   : > { %146 = sbr.rel (%p143_p9) target bundleno = 391 (0x187), region = 32  ;;  %p168_p10 = scmp.lt.s32.totalorder (!%p143_p9), %s418_s24, 5  ;;  %451 = vmatprep.subr.bf16.mxu0 (!%p143_p9), %v583_v1  ;;  %v516_v13 = vld [vmem:[%s737_s1 + $0x18] sm:$0xff] (!%p143_p9)   ;;  %463 = vmatprep.mubr.msk.bf16.mxu0 (!%p143_p9), %vm584_vm0, %v583_v1  ;;  %v517_v20 = vld [vmem:[%s737_s1 + $0x20] sm:$0xff] (!%p143_p9)   ;;  %v518_v22 = vld [vmem:[%s737_s1 + $0x28] sm:$0xff] (!%p143_p9)   ;;  %vm214_vm1 = vcmask (!%p143_p9), 261120  }
   0xf   : > { %452 = vmatpush3.bf16.msra.mxu0 (!%p143_p9), %v513_v0  ;;  %s585_s10 = smov (!%p143_p9), 64   ;;  %s586_s19 = smov (!%p143_p9), 32   ;;  %vm221_vm2 = vcmask (!%p143_p9), 523264   ;;  %vm286_vm3 = vcmask (!%p143_p9), 785408   ;;  %v423_v32 = vld [vmem:[%s738_s2] ss:$0 sm:$0xff] (!%p143_p9) }
  0x10   : > { %453 = vmatprep.subr.bf16.mxu0 (!%p143_p9), %v583_v1  ;;  %s164_s25 = sand.u32 (!%p143_p9), 1, %s573_s13   ;;  %s438_s4 = sshll.u32 (!%p143_p9), %s630_s16, 7 }
  0x11   : > { %s417_s26 = sshll.u32 (!%p143_p9), %s164_s25, 3  ;;  %s691_s7 = scalar_lea.hbm (!%p143_p9), %s739_s3, %s438_s4 }
  0x12   : > { %s693_s8 = scalar_lea.sflag (!%p143_p9), [#allocation3], %s164_s25  ;;  %s587_s16 = smov (!%p143_p9), [#allocation2]  }
  0x13   : > { %454 = vmatpush3.bf16.msra.mxu0 (!%p143_p9), %v514_v2  ;;  %s523_s11 = sshll.u32 (!%p143_p9), %s587_s16, 4  ;;  %s524_s11 = int_to_ptr.vmem [resolvable:$false] %s523_s11 }
  0x14   : > { %455 = vmatprep.subr.bf16.mxu0 (!%p143_p9), %v583_v1  ;;  %s525_s17 = scalar_lea.vmem (!%p143_p9), %s524_s11, 256 }
  0x15   : > { %s747_s24 = smov (!%p168_p10, %s418_s24), 5 }
  0x16   : > { %s437_s29 = sshll.u32 %s747_s24, 3 }
  0x17   : > { %s172_s5 = scalar_lea.vmem %s736_s0, %s437_s29  ;;  %456 = vmatpush3.bf16.msra.mxu0 %v515_v3  ;;  %s166_s29 = scalar_lea.vmem [#allocation2], %s417_s26 }
  0x18   : > { %v176_v4 = vld [vmem:[%s172_s5] sm:$0xf]  ;;  %v177_v5 = vld [vmem:[%s172_s5 + $0x4] sm:$0x1]  ;;  %v178_v6 = vld [vmem:[%s172_s5 + $0x8] sm:$0xf]  ;;  %457 = vmatprep.subr.bf16.mxu0 %v583_v1 }
  0x19   : > { %v421_v7 = vcombine.low %v176_v4, %v177_v5  ;;  %v179_v8 = vld [vmem:[%s172_s5 + $0xc] sm:$0x1]  ;;  %s351_s30 = sshll.u32 %s166_s29, 4  ;;  %s686_s30 = int_to_ptr.vmem [resolvable:$true] %s351_s30 }
  0x1a   : > { %v422_v9 = vcombine.low %v178_v6, %v179_v8  ;;  %s519_s9 = scalar_lea.vmem %s686_s30, 128  ;;  %p526_p0 = scmp.lt.s32.totalorder %s686_s30, %s524_s11 }
  0x1b   : > { %v191_v10 = vshrl.u32 %v421_v7, 16  ;;  %v193_v11 = vshll.u32 %v421_v7, 16  ;;  %v208_v12 = vrot.slane %v421_v7, 1  ;;  %458 = vmatpush3.bf16.msra.mxu0 %v516_v13  ;;  %p520_p11 = scmp.ne.s32.totalorder %s686_s30, %s519_s9  ;;  %p527_p1 = scmp.lt.s32.totalorder %s525_s17, %s519_s9 }
  0x1c   : > { %v200_v14 = vshll.u32 %v422_v9, 16  ;;  %v198_v16 = vshrl.u32 %v422_v9, 16  ;;  %v209_v17 = vrot.slane %v422_v9, 1  ;;  %459 = vmatprep.subr.bf16.mxu0 %v583_v1 }
  0x1d   : > { %v195_v15 = vrot.slane %v193_v11, 1  ;;  %210 = vrot.lane.b32.xlu1 %v208_v12, %s585_s10  ;;  %p521_p12 = pnand %p520_p11, %p647_p5  ;;  %p528_p2 = por %p527_p1, %p526_p0 }
  0x1e   : > { %v202_v18 = vrot.slane %v200_v14, 1 }
  0x1f   : > { %v196_v19 = vor.u32 %v195_v15, %v191_v10  ;;  %460 = vmatpush3.bf16.msra.mxu0 %v517_v20  ;;  %p522_p13 = pneg %p521_p12 }
  0x20   : > { %v203_v21 = vor.u32 %v202_v18, %v198_v16  ;;  %461 = vmatprep.subr.bf16.mxu0 %v583_v1 }
  0x21   : > { %204 = vrot.lane.b32.xlu0 %v196_v19, %s586_s19  ;;  %212 = vrot.lane.b32.xlu1 %v209_v17, %s585_s10  ;;  %p529_p3 = pnand %p528_p2, %p522_p13 }
  0x23   : > { %462 = vmatpush3.bf16.msra.mxu0 %v518_v22 }
  0x25   : > { %206 = vrot.lane.b32.xlu0 %v203_v21, %s586_s19 }
  0x8f   : > { %v211_v23 = vpop.permute.xlu1 %210 }
  0x93   : > { %v205_v24 = vpop.permute.xlu0 %204  ;;  %v213_v26 = vpop.permute.xlu1 %212 }
  0x94   : > { %v217_v25 = vsel %vm214_vm1, %v176_v4, %v205_v24 }
  0x95   : > { %v223_v29 = vsel %vm221_vm2, %v217_v25, %v211_v23 }
  0x97   : > { %v207_v27 = vpop.permute.xlu0 %206 }
  0x98   : > { %v220_v28 = vsel %vm214_vm1, %v178_v6, %v207_v27 }
  0x99   : > { %v225_v30 = vsel %vm221_vm2, %v220_v28, %v213_v26 }
  0x9a   : > { %v424_v31 = vcombine.low %v223_v29, %v225_v30 }
  0x9c   : > { %464 = vmatmul.mubr.msk.bf16.vlgmr.msra.gmra.mrb[0].mxu0 %vm286_vm3, %v424_v31 }
 0x16f   : > { %v324_v33 = vpop.f32.mrb[0].mxu0 }
 0x170   : > { %v325_v34 = vadd.f32 %v423_v32, %v324_v33  ;;  %v465_v35 = vpop.f32.mrb[1].mxu0 }
 0x171   : > { %v327_v36 = vpop.f32.mrb[2].mxu0 }
 0x172   : > { %v328_v37 = vadd.f32 %v423_v32, %v327_v36  ;;  %v466_v38 = vpop.f32.mrb[3].mxu0  ;;  %v331_v39 = vmax.f32 %v325_v34, 0.0 }
 0x174   : > { %v332_v40 = vmax.f32 %v328_v37, 0.0 }
 0x176   : > { %v442_v41 = vpack.c.bf16 %v332_v40, %v331_v39 }
 0x178   : > { %443 = vst [vmem:[%s166_s29] sm:$0xff] %v442_v41  }
 0x179   : > { %532 = shalt.err (!%p529_p3)
}
 0x17a   : > { %s533_s19 = scalar_lea.hbm %s691_s7, 128  ;;  %s537_s25 = scalar_lea.hbm %s739_s3, 384 }
 0x17b   : > { %p534_p4 = scmp.ne.s32.totalorder %s691_s7, %s533_s19  ;;  %p538_p9 = scmp.lt.u32.totalorder %s691_s7, %s739_s3 }
 0x17c   : > { %p539_p10 = scmp.lt.u32.totalorder %s537_s25, %s533_s19  ;;  %p541_p12 = scmp.lt.u32.totalorder %s533_s19, %s691_s7 }
 0x17d   : > { %p535_p7 = pnand %p534_p4, %p647_p5 }
 0x17e   : > { %p540_p11 = por %p539_p10, %p538_p9 }
 0x17f   : > { %p536_p8 = pneg %p535_p7 }
 0x180   : > { %p542_p13 = por %p541_p12, %p540_p11 }
 0x182   : > { %p543_p0 = pnand %p542_p13, %p536_p8 }
 0x184   : > { %546 = shalt.err (!%p543_p0)
}
 0x185   : > { %s588_s28 = smov 4  }
 0x186   : > { %467 = dma.vmem_to_hbm [thread:$0]  (%p647_p5), %s686_s30, 128, %s691_s7, %s693_s8, %s585_s10, %s585_s10, %s588_s28  }
 0x187 PF: > { %p473_p1 = scmp.ge.s32.totalorder %s581_s15, 2  ;;  %s366_s29 = sand.u32 1, %s569_s12  }
 0x188   : > { %s367_s4 = scalar_lea.sflag [#allocation3], %s366_s29 }
 0x189   : > { %p470_p2 = pnand %p473_p1, %p651_p6 }
 0x18b   : > { %564 = dma.done.wait (!%p470_p2), %s367_s4, 128  }
 0x18c   : > { %566 = vsyncadd (!%p470_p2), %s367_s4, 4294967168  ;;  %p13_p3 = scmp.ge.s32.totalorder %s634_s18, 5   ;;  %s742_s12 = smov %s573_s13 }
 0x18d   : > { %s743_s13 = smov %s577_s14  ;;  %s744_s14 = smov %s645_s21 }
 0x18e   : > { %s745_s15 = smov %s634_s18  ;;  %15 = sbr.rel (!%p13_p3) target bundleno = 3 (0x3), region = 67 }
 0x195   :  { %372 = vsyncpa [#allocation3], 1 }
 0x196   :  { %374 = vsyncpa [#allocation3 + $0x1], 1 }

</bundles_post_ra>
